<compile_context>
chip_gen: v5e
topology: v5e:2x2
jax: 0.10.0
libtpu: 0.0.40
codegen_flags: <defaults>
</compile_context>

<pallas_src>
import functools

import jax
import jax.numpy as jnp
from jax.experimental import pallas as pl
from jax.experimental.pallas import tpu as pltpu


# ----------------------------- Pallas kernel ------------------------------- #

def gpt_stack_kernel(x_ref, mask_ref,
                     ln1_w_ref, ln1_b_ref,
                     w_qkv_ref, b_qkv_ref,
                     wo_ref, bo_ref,
                     ln2_w_ref, ln2_b_ref,
                     w1_ref, b1_ref, w2_ref, b2_ref,
                     out_ref,
                     *, num_heads, norm_eps, n_layers):
    S = x_ref.shape[1]
    D = x_ref.shape[2]
    hd = D // num_heads
    scale = 1.0 / (hd ** 0.5)

    x0 = x_ref[0].astype(jnp.float32)            # (S, D) f32 residual stream
    mask = mask_ref[...]                         # (S, S) f32 additive causal mask

    def layernorm(h, w, b):                      # f32 statistics, biased variance
        mu = jnp.mean(h, axis=-1, keepdims=True)
        var = jnp.mean((h - mu) ** 2, axis=-1, keepdims=True)
        return (h - mu) * jax.lax.rsqrt(var + norm_eps) * w + b

    def layer_body(l, x):
        # ---------------- attention sub-layer (pre-LN) ---------------- #
        h = layernorm(x, ln1_w_ref[l], ln1_b_ref[l])
        # Fused QKV: bf16 operands, f32 accumulate -> (S, 3D) f32.
        qkv = jnp.dot(h.astype(jnp.bfloat16), w_qkv_ref[l],
                      preferred_element_type=jnp.float32) + b_qkv_ref[l]
        # Single bf16 pass over Q/K/V; fold the softmax scale into Q here so it
        # is an (S, D) multiply, not an (S, S) multiply per head.
        q_all = (qkv[:, :D] * scale).astype(jnp.bfloat16)
        k_all = qkv[:, D:2 * D].astype(jnp.bfloat16)
        v_all = qkv[:, 2 * D:].astype(jnp.bfloat16)
        wo = wo_ref[l]                           # (D, D) bf16, sliced per head

        attn = jnp.zeros((S, D), jnp.float32)
        for hix in range(num_heads):             # static unroll (small head count)
            sl = slice(hix * hd, (hix + 1) * hd)
            qh, kh, vh = q_all[:, sl], k_all[:, sl], v_all[:, sl]
            # Q @ K^T without materializing the transpose (contract last dims).
            s = jax.lax.dot_general(qh, kh, (((1,), (1,)), ((), ())),
                                    preferred_element_type=jnp.float32)
            s = s + mask
            s = s - jnp.max(s, axis=-1, keepdims=True)
            p = jnp.exp(s)
            p = p * pl.reciprocal(jnp.sum(p, axis=-1, keepdims=True), approx=True)
            oh = jnp.dot(p.astype(jnp.bfloat16), vh,
                         preferred_element_type=jnp.float32)        # (S, hd)
            # Fold the output projection into the head loop: no attn_buf.
            attn = attn + jnp.dot(oh.astype(jnp.bfloat16), wo[sl, :],
                                  preferred_element_type=jnp.float32)
        x = x + attn + bo_ref[l]                 # f32 residual add (+ out bias)

        # ---------------- feed-forward sub-layer (pre-LN) ---------------- #
        h2 = layernorm(x, ln2_w_ref[l], ln2_b_ref[l])
        f = jnp.dot(h2.astype(jnp.bfloat16), w1_ref[l],
                    preferred_element_type=jnp.float32) + b1_ref[l]
        f = jax.nn.gelu(f)                       # f32 (tanh approx)
        f = jnp.dot(f.astype(jnp.bfloat16), w2_ref[l],
                    preferred_element_type=jnp.float32) + b2_ref[l]
        return x + f

    x_final = jax.lax.fori_loop(0, n_layers, layer_body, x0)
    out_ref[0] = x_final.astype(out_ref.dtype)


PARAM_NAMES = ["ln1_w", "ln1_b",
               "w_qkv", "b_qkv",
               "wo", "bo",
               "ln2_w", "ln2_b",
               "w1", "b1", "w2", "b2"]


def gpt_stage(x, params, *, num_heads, norm_eps):
    """Sequential stack of GPT blocks (== GPTStage.forward) in one pallas_call."""
    B, S, D = x.shape
    assert D % num_heads == 0, "dmodel must be divisible by num_heads"
    n_layers = params["w_qkv"].shape[0]

    # Additive causal mask, built once on the host side of the call and kept
    # resident in VMEM (constant index_map -> DMA'd a single time).
    row = jax.lax.broadcasted_iota(jnp.int32, (S, S), 0)
    col = jax.lax.broadcasted_iota(jnp.int32, (S, S), 1)
    mask_add = jnp.where(row >= col, 0.0, -1e30).astype(jnp.float32)

    kernel = functools.partial(gpt_stack_kernel, num_heads=num_heads,
                               norm_eps=norm_eps, n_layers=n_layers)

    def resident_spec(arr):
        # Whole stacked array as one block; block index never changes across
        # grid steps -> fetched once, stays resident in VMEM.
        nd = arr.ndim
        return pl.BlockSpec(arr.shape, lambda b, _n=nd: (0,) * _n)

    in_specs = [pl.BlockSpec((1, S, D), lambda b: (b, 0, 0)),
                resident_spec(mask_add)]
    args = [x, mask_add]
    for name in PARAM_NAMES:
        p = params[name]
        in_specs.append(resident_spec(p))
        args.append(p)

    return pl.pallas_call(
        kernel,
        out_shape=jax.ShapeDtypeStruct((B, S, D), x.dtype),
        grid=(B,),
        in_specs=in_specs,
        out_specs=pl.BlockSpec((1, S, D), lambda b: (b, 0, 0)),
        compiler_params=pltpu.CompilerParams(
            dimension_semantics=("parallel",)),
    )(*args)


# -------------------------- parameter construction ------------------------- #

def init_block_params(key, dmodel, dff):
    ks = jax.random.split(key, 6)
    n = lambda k, shape: jax.random.normal(k, shape, jnp.float32) * 0.02
    ones = lambda shape: jnp.ones(shape, jnp.float32)
    zeros = lambda shape: jnp.zeros(shape, jnp.float32)
    wq, wk, wv = (n(ks[0], (dmodel, dmodel)), n(ks[1], (dmodel, dmodel)),
                  n(ks[2], (dmodel, dmodel)))
    return {
        "ln1_w": ones((1, dmodel)), "ln1_b": zeros((1, dmodel)),
        "w_qkv": jnp.concatenate([wq, wk, wv], axis=-1),   # packed (D, 3D)
        "b_qkv": zeros((1, 3 * dmodel)),
        "wo": n(ks[3], (dmodel, dmodel)), "bo": zeros((1, dmodel)),
        "ln2_w": ones((1, dmodel)), "ln2_b": zeros((1, dmodel)),
        "w1": n(ks[4], (dmodel, dff)), "b1": zeros((1, dff)),
        "w2": n(ks[5], (dff, dmodel)), "b2": zeros((1, dmodel)),
    }


def init_stack_params(key, n_layers, dmodel, dff):
    keys = jax.random.split(key, n_layers)
    per = [init_block_params(k, dmodel, dff) for k in keys]
    return {name: jnp.stack([p[name] for p in per]) for name in per[0]}


_BF16_WEIGHTS = ("w_qkv", "wo", "w1", "w2")


def split_kernel_ref_params(stacked):
    """Kernel gets bf16 matmul weights; reference uses the same (bf16-rounded)
    values in f32 so both see identical parameters."""
    kparams, rparams = {}, {}
    for name, v in stacked.items():
        if name in _BF16_WEIGHTS:
            vb = v.astype(jnp.bfloat16)
            kparams[name] = vb
            rparams[name] = vb.astype(jnp.float32)
        else:
            kparams[name] = v
            rparams[name] = v
    return kparams, rparams


# ------------------------------ JAX reference ------------------------------ #

def stage_ref(x, params, *, num_heads, norm_eps):
    n_layers = params["w_qkv"].shape[0]
    B, S, D = x.shape
    hd = D // num_heads
    mask = jnp.tril(jnp.ones((S, S), bool))

    def ln(h, w, b):
        mu = h.mean(-1, keepdims=True)
        var = ((h - mu) ** 2).mean(-1, keepdims=True)
        return (h - mu) * jax.lax.rsqrt(var + norm_eps) * w + b

    for l in range(n_layers):
        h = ln(x, params["ln1_w"][l], params["ln1_b"][l])
        qkv = h @ params["w_qkv"][l] + params["b_qkv"][l]
        q, k, v = qkv[..., :D], qkv[..., D:2 * D], qkv[..., 2 * D:]
        q = q.reshape(B, S, num_heads, hd).transpose(0, 2, 1, 3)
        k = k.reshape(B, S, num_heads, hd).transpose(0, 2, 1, 3)
        v = v.reshape(B, S, num_heads, hd).transpose(0, 2, 1, 3)
        s = jnp.einsum("bhqd,bhkd->bhqk", q, k) / jnp.sqrt(jnp.float32(hd))
        s = jnp.where(mask, s, -1e30)
        a = jax.nn.softmax(s, -1)
        o = jnp.einsum("bhqk,bhkd->bhqd", a, v).transpose(0, 2, 1, 3).reshape(B, S, D)
        x = x + (o @ params["wo"][l] + params["bo"][l])
        h2 = ln(x, params["ln2_w"][l], params["ln2_b"][l])
        f = jax.nn.gelu(h2 @ params["w1"][l] + params["b1"][l]) @ params["w2"][l] + params["b2"][l]
        x = x + f
    return x


# ----------------------------------- main ----------------------------------- #

if __name__ == "__main__":
    # GPTStage(dmodel=32, num_heads=4, dim_feedforward=0 -> 4*dmodel, n_layers=4)
    B, S = 2, 8
    dmodel, num_heads, n_layers = 32, 4, 4
    dff = 4 * dmodel          # dim_feedforward == 0 -> default 4 * dmodel
    norm_eps = 1e-5

    root = jax.random.PRNGKey(0)
    kx, kp = jax.random.split(root)
    x = jax.random.normal(kx, (B, S, dmodel), jnp.float32)

    stacked = init_stack_params(kp, n_layers, dmodel, dff)
    kernel_params, ref_params = split_kernel_ref_params(stacked)

    out = gpt_stage(x, kernel_params, num_heads=num_heads, norm_eps=norm_eps)
    out = jax.block_until_ready(out)

    ref = stage_ref(x, ref_params, num_heads=num_heads, norm_eps=norm_eps)
    assert out.shape == (B, S, dmodel)
    # Kernel uses bf16 MXU operands (f32 accumulate) + approx reciprocal softmax;
    # reference is full f32 with the same (bf16-rounded) weights.
    assert jnp.allclose(out, ref, rtol=2e-2, atol=2e-2), "mismatch vs JAX reference"

    print("KERNEL_OK")
</pallas_src>

<mosaic_0001>
module attributes {stable_mosaic.version = 11 : i64} {
  func.func @gpt_stack_kernel(%arg0: i32, %arg1: memref<1x8x32xf32, #tpu.memory_space<vmem>>, %arg2: memref<8x8xf32, #tpu.memory_space<vmem>>, %arg3: memref<4x1x32xf32, #tpu.memory_space<vmem>>, %arg4: memref<4x1x32xf32, #tpu.memory_space<vmem>>, %arg5: memref<4x32x96xbf16, #tpu.memory_space<vmem>>, %arg6: memref<4x1x96xf32, #tpu.memory_space<vmem>>, %arg7: memref<4x32x32xbf16, #tpu.memory_space<vmem>>, %arg8: memref<4x1x32xf32, #tpu.memory_space<vmem>>, %arg9: memref<4x1x32xf32, #tpu.memory_space<vmem>>, %arg10: memref<4x1x32xf32, #tpu.memory_space<vmem>>, %arg11: memref<4x32x128xbf16, #tpu.memory_space<vmem>>, %arg12: memref<4x1x128xf32, #tpu.memory_space<vmem>>, %arg13: memref<4x128x32xbf16, #tpu.memory_space<vmem>>, %arg14: memref<4x1x32xf32, #tpu.memory_space<vmem>>, %arg15: memref<1x8x32xf32, #tpu.memory_space<vmem>>) attributes {dimension_semantics = [#tpu.dimension_semantics<parallel>], iteration_bounds = array<i64: 2>, scalar_prefetch = 0 : i64, scratch_operands = 0 : i64, tpu.core_type = #tpu.core_type<tc>, window_params = [{transform_indices = @transform_0, window_bounds = array<i64: 1, 8, 32>}, {pipeline_mode = #tpu.pipeline_mode<synchronous>, transform_indices = @transform_1, window_bounds = array<i64: 8, 8>}, {pipeline_mode = #tpu.pipeline_mode<synchronous>, transform_indices = @transform_2, window_bounds = array<i64: 4, 1, 32>}, {pipeline_mode = #tpu.pipeline_mode<synchronous>, transform_indices = @transform_3, window_bounds = array<i64: 4, 1, 32>}, {pipeline_mode = #tpu.pipeline_mode<synchronous>, transform_indices = @transform_4, window_bounds = array<i64: 4, 32, 96>}, {pipeline_mode = #tpu.pipeline_mode<synchronous>, transform_indices = @transform_5, window_bounds = array<i64: 4, 1, 96>}, {pipeline_mode = #tpu.pipeline_mode<synchronous>, transform_indices = @transform_6, window_bounds = array<i64: 4, 32, 32>}, {pipeline_mode = #tpu.pipeline_mode<synchronous>, transform_indices = @transform_7, window_bounds = array<i64: 4, 1, 32>}, {pipeline_mode = #tpu.pipeline_mode<synchronous>, transform_indices = @transform_8, window_bounds = array<i64: 4, 1, 32>}, {pipeline_mode = #tpu.pipeline_mode<synchronous>, transform_indices = @transform_9, window_bounds = array<i64: 4, 1, 32>}, {pipeline_mode = #tpu.pipeline_mode<synchronous>, transform_indices = @transform_10, window_bounds = array<i64: 4, 32, 128>}, {pipeline_mode = #tpu.pipeline_mode<synchronous>, transform_indices = @transform_11, window_bounds = array<i64: 4, 1, 128>}, {pipeline_mode = #tpu.pipeline_mode<synchronous>, transform_indices = @transform_12, window_bounds = array<i64: 4, 128, 32>}, {pipeline_mode = #tpu.pipeline_mode<synchronous>, transform_indices = @transform_13, window_bounds = array<i64: 4, 1, 32>}, {transform_indices = @transform_14, window_bounds = array<i64: 1, 8, 32>}]} {
    %c0 = arith.constant 0 : index
    %c0_0 = arith.constant 0 : index
    %c0_1 = arith.constant 0 : index
    %0 = vector.load %arg1[%c0, %c0_0, %c0_1] : memref<1x8x32xf32, #tpu.memory_space<vmem>>, vector<1x8x32xf32>
    %1 = vector.shape_cast %0 : vector<1x8x32xf32> to vector<8x32xf32>
    %c0_2 = arith.constant 0 : index
    %c0_3 = arith.constant 0 : index
    %2 = vector.load %arg2[%c0_2, %c0_3] : memref<8x8xf32, #tpu.memory_space<vmem>>, vector<8x8xf32>
    %c0_i32 = arith.constant 0 : i32
    %c4_i32 = arith.constant 4 : i32
    %3 = arith.addi %c0_i32, %c4_i32 : i32
    %c1_i32 = arith.constant 1 : i32
    %4 = scf.for %arg16 = %c0_i32 to %3 step %c1_i32 iter_args(%arg17 = %1) -> (vector<8x32xf32>)  : i32 {
      %8 = arith.index_cast %arg16 : i32 to index
      %c0_8 = arith.constant 0 : index
      %c0_9 = arith.constant 0 : index
      %9 = vector.load %arg3[%8, %c0_8, %c0_9] : memref<4x1x32xf32, #tpu.memory_space<vmem>>, vector<1x1x32xf32>
      %10 = vector.shape_cast %9 : vector<1x1x32xf32> to vector<1x32xf32>
      %11 = arith.index_cast %arg16 : i32 to index
      %c0_10 = arith.constant 0 : index
      %c0_11 = arith.constant 0 : index
      %12 = vector.load %arg4[%11, %c0_10, %c0_11] : memref<4x1x32xf32, #tpu.memory_space<vmem>>, vector<1x1x32xf32>
      %13 = vector.shape_cast %12 : vector<1x1x32xf32> to vector<1x32xf32>
      %cst = arith.constant dense<0.000000e+00> : vector<8xf32>
      %14 = vector.multi_reduction <add>, %arg17, %cst [1] : vector<8x32xf32> to vector<8xf32>
      %15 = vector.shape_cast %14 : vector<8xf32> to vector<8x1xf32>
      %cst_12 = arith.constant 3.200000e+01 : f32
      %16 = vector.broadcast %cst_12 : f32 to vector<8x1xf32>
      %17 = arith.divf %15, %16 : vector<8x1xf32>
      %18 = vector.broadcast %17 : vector<8x1xf32> to vector<8x32xf32>
      %19 = arith.subf %arg17, %18 : vector<8x32xf32>
      %20 = arith.mulf %19, %19 : vector<8x32xf32>
      %cst_13 = arith.constant dense<0.000000e+00> : vector<8xf32>
      %21 = vector.multi_reduction <add>, %20, %cst_13 [1] : vector<8x32xf32> to vector<8xf32>
      %22 = vector.shape_cast %21 : vector<8xf32> to vector<8x1xf32>
      %cst_14 = arith.constant 3.200000e+01 : f32
      %23 = vector.broadcast %cst_14 : f32 to vector<8x1xf32>
      %24 = arith.divf %22, %23 : vector<8x1xf32>
      %25 = vector.broadcast %17 : vector<8x1xf32> to vector<8x32xf32>
      %26 = arith.subf %arg17, %25 : vector<8x32xf32>
      %cst_15 = arith.constant 9.99999974E-6 : f32
      %27 = vector.broadcast %cst_15 : f32 to vector<8x1xf32>
      %28 = arith.addf %24, %27 : vector<8x1xf32>
      %29 = math.rsqrt %28 : vector<8x1xf32>
      %30 = vector.broadcast %29 : vector<8x1xf32> to vector<8x32xf32>
      %31 = arith.mulf %26, %30 : vector<8x32xf32>
      %32 = vector.broadcast %10 : vector<1x32xf32> to vector<8x32xf32>
      %33 = arith.mulf %31, %32 : vector<8x32xf32>
      %34 = vector.broadcast %13 : vector<1x32xf32> to vector<8x32xf32>
      %35 = arith.addf %33, %34 : vector<8x32xf32>
      %36 = arith.truncf %35 : vector<8x32xf32> to vector<8x32xbf16>
      %37 = arith.index_cast %arg16 : i32 to index
      %c0_16 = arith.constant 0 : index
      %c0_17 = arith.constant 0 : index
      %38 = vector.load %arg5[%37, %c0_16, %c0_17] : memref<4x32x96xbf16, #tpu.memory_space<vmem>>, vector<1x32x96xbf16>
      %39 = vector.shape_cast %38 : vector<1x32x96xbf16> to vector<32x96xbf16>
      %cst_18 = arith.constant dense<0.000000e+00> : vector<8x96xf32>
      %40 = tpu.matmul %36, %39, %cst_18 {dimension_numbers = #tpu.dot_dimension_numbers<[1], [0], [0], [1], [0, 0, 1, 1], [], []>} : vector<8x32xbf16>, vector<32x96xbf16>, vector<8x96xf32> -> vector<8x96xf32>
      %41 = arith.index_cast %arg16 : i32 to index
      %c0_19 = arith.constant 0 : index
      %c0_20 = arith.constant 0 : index
      %42 = vector.load %arg6[%41, %c0_19, %c0_20] : memref<4x1x96xf32, #tpu.memory_space<vmem>>, vector<1x1x96xf32>
      %43 = vector.shape_cast %42 : vector<1x1x96xf32> to vector<1x96xf32>
      %44 = vector.broadcast %43 : vector<1x96xf32> to vector<8x96xf32>
      %45 = arith.addf %40, %44 : vector<8x96xf32>
      %46 = vector.extract_strided_slice %45 {offsets = [0, 0], sizes = [8, 32], strides = [1, 1]} : vector<8x96xf32> to vector<8x32xf32>
      %cst_21 = arith.constant 0.353553385 : f32
      %47 = vector.broadcast %cst_21 : f32 to vector<8x32xf32>
      %48 = arith.mulf %46, %47 : vector<8x32xf32>
      %49 = arith.truncf %48 : vector<8x32xf32> to vector<8x32xbf16>
      %50 = vector.extract_strided_slice %45 {offsets = [0, 32], sizes = [8, 32], strides = [1, 1]} : vector<8x96xf32> to vector<8x32xf32>
      %51 = arith.truncf %50 : vector<8x32xf32> to vector<8x32xbf16>
      %52 = vector.extract_strided_slice %45 {offsets = [0, 64], sizes = [8, 32], strides = [1, 1]} : vector<8x96xf32> to vector<8x32xf32>
      %53 = arith.truncf %52 : vector<8x32xf32> to vector<8x32xbf16>
      %54 = arith.index_cast %arg16 : i32 to index
      %c0_22 = arith.constant 0 : index
      %c0_23 = arith.constant 0 : index
      %55 = vector.load %arg7[%54, %c0_22, %c0_23] : memref<4x32x32xbf16, #tpu.memory_space<vmem>>, vector<1x32x32xbf16>
      %56 = vector.shape_cast %55 : vector<1x32x32xbf16> to vector<32x32xbf16>
      %cst_24 = arith.constant 0.000000e+00 : f32
      %57 = vector.broadcast %cst_24 : f32 to vector<8x32xf32>
      %58 = vector.extract_strided_slice %49 {offsets = [0, 0], sizes = [8, 8], strides = [1, 1]} : vector<8x32xbf16> to vector<8x8xbf16>
      %59 = vector.extract_strided_slice %51 {offsets = [0, 0], sizes = [8, 8], strides = [1, 1]} : vector<8x32xbf16> to vector<8x8xbf16>
      %60 = vector.extract_strided_slice %53 {offsets = [0, 0], sizes = [8, 8], strides = [1, 1]} : vector<8x32xbf16> to vector<8x8xbf16>
      %cst_25 = arith.constant dense<0.000000e+00> : vector<8x8xf32>
      %61 = tpu.matmul %58, %59, %cst_25 {dimension_numbers = #tpu.dot_dimension_numbers<[1], [1], [0], [0], [0, 0, 1, 0], [], []>} : vector<8x8xbf16>, vector<8x8xbf16>, vector<8x8xf32> -> vector<8x8xf32>
      %62 = arith.addf %61, %2 : vector<8x8xf32>
      %cst_26 = arith.constant dense<0xFF800000> : vector<8xf32>
      %63 = vector.multi_reduction <maximumf>, %62, %cst_26 [1] : vector<8x8xf32> to vector<8xf32>
      %64 = vector.shape_cast %63 : vector<8xf32> to vector<8x1xf32>
      %65 = vector.broadcast %64 : vector<8x1xf32> to vector<8x8xf32>
      %66 = arith.subf %62, %65 : vector<8x8xf32>
      %67 = math.exp %66 : vector<8x8xf32>
      %cst_27 = arith.constant dense<0.000000e+00> : vector<8xf32>
      %68 = vector.multi_reduction <add>, %67, %cst_27 [1] : vector<8x8xf32> to vector<8xf32>
      %69 = vector.shape_cast %68 : vector<8xf32> to vector<8x1xf32>
      %70 = tpu.reciprocal %69 {approx = true} : vector<8x1xf32> -> vector<8x1xf32>
      %71 = vector.broadcast %70 : vector<8x1xf32> to vector<8x8xf32>
      %72 = arith.mulf %67, %71 : vector<8x8xf32>
      %73 = arith.truncf %72 : vector<8x8xf32> to vector<8x8xbf16>
      %cst_28 = arith.constant dense<0.000000e+00> : vector<8x8xf32>
      %74 = tpu.matmul %73, %60, %cst_28 {dimension_numbers = #tpu.dot_dimension_numbers<[1], [0], [0], [1], [0, 0, 1, 1], [], []>} : vector<8x8xbf16>, vector<8x8xbf16>, vector<8x8xf32> -> vector<8x8xf32>
      %75 = arith.truncf %74 : vector<8x8xf32> to vector<8x8xbf16>
      %76 = vector.extract_strided_slice %56 {offsets = [0, 0], sizes = [8, 32], strides = [1, 1]} : vector<32x32xbf16> to vector<8x32xbf16>
      %cst_29 = arith.constant dense<0.000000e+00> : vector<8x32xf32>
      %77 = tpu.matmul %75, %76, %cst_29 {dimension_numbers = #tpu.dot_dimension_numbers<[1], [0], [0], [1], [0, 0, 1, 1], [], []>} : vector<8x8xbf16>, vector<8x32xbf16>, vector<8x32xf32> -> vector<8x32xf32>
      %78 = arith.addf %57, %77 : vector<8x32xf32>
      %79 = vector.extract_strided_slice %49 {offsets = [0, 8], sizes = [8, 8], strides = [1, 1]} : vector<8x32xbf16> to vector<8x8xbf16>
      %80 = vector.extract_strided_slice %51 {offsets = [0, 8], sizes = [8, 8], strides = [1, 1]} : vector<8x32xbf16> to vector<8x8xbf16>
      %81 = vector.extract_strided_slice %53 {offsets = [0, 8], sizes = [8, 8], strides = [1, 1]} : vector<8x32xbf16> to vector<8x8xbf16>
      %cst_30 = arith.constant dense<0.000000e+00> : vector<8x8xf32>
      %82 = tpu.matmul %79, %80, %cst_30 {dimension_numbers = #tpu.dot_dimension_numbers<[1], [1], [0], [0], [0, 0, 1, 0], [], []>} : vector<8x8xbf16>, vector<8x8xbf16>, vector<8x8xf32> -> vector<8x8xf32>
      %83 = arith.addf %82, %2 : vector<8x8xf32>
      %cst_31 = arith.constant dense<0xFF800000> : vector<8xf32>
      %84 = vector.multi_reduction <maximumf>, %83, %cst_31 [1] : vector<8x8xf32> to vector<8xf32>
      %85 = vector.shape_cast %84 : vector<8xf32> to vector<8x1xf32>
      %86 = vector.broadcast %85 : vector<8x1xf32> to vector<8x8xf32>
      %87 = arith.subf %83, %86 : vector<8x8xf32>
      %88 = math.exp %87 : vector<8x8xf32>
      %cst_32 = arith.constant dense<0.000000e+00> : vector<8xf32>
      %89 = vector.multi_reduction <add>, %88, %cst_32 [1] : vector<8x8xf32> to vector<8xf32>
      %90 = vector.shape_cast %89 : vector<8xf32> to vector<8x1xf32>
      %91 = tpu.reciprocal %90 {approx = true} : vector<8x1xf32> -> vector<8x1xf32>
      %92 = vector.broadcast %91 : vector<8x1xf32> to vector<8x8xf32>
      %93 = arith.mulf %88, %92 : vector<8x8xf32>
      %94 = arith.truncf %93 : vector<8x8xf32> to vector<8x8xbf16>
      %cst_33 = arith.constant dense<0.000000e+00> : vector<8x8xf32>
      %95 = tpu.matmul %94, %81, %cst_33 {dimension_numbers = #tpu.dot_dimension_numbers<[1], [0], [0], [1], [0, 0, 1, 1], [], []>} : vector<8x8xbf16>, vector<8x8xbf16>, vector<8x8xf32> -> vector<8x8xf32>
      %96 = arith.truncf %95 : vector<8x8xf32> to vector<8x8xbf16>
      %97 = vector.extract_strided_slice %56 {offsets = [8, 0], sizes = [8, 32], strides = [1, 1]} : vector<32x32xbf16> to vector<8x32xbf16>
      %cst_34 = arith.constant dense<0.000000e+00> : vector<8x32xf32>
      %98 = tpu.matmul %96, %97, %cst_34 {dimension_numbers = #tpu.dot_dimension_numbers<[1], [0], [0], [1], [0, 0, 1, 1], [], []>} : vector<8x8xbf16>, vector<8x32xbf16>, vector<8x32xf32> -> vector<8x32xf32>
      %99 = arith.addf %78, %98 : vector<8x32xf32>
      %100 = vector.extract_strided_slice %49 {offsets = [0, 16], sizes = [8, 8], strides = [1, 1]} : vector<8x32xbf16> to vector<8x8xbf16>
      %101 = vector.extract_strided_slice %51 {offsets = [0, 16], sizes = [8, 8], strides = [1, 1]} : vector<8x32xbf16> to vector<8x8xbf16>
      %102 = vector.extract_strided_slice %53 {offsets = [0, 16], sizes = [8, 8], strides = [1, 1]} : vector<8x32xbf16> to vector<8x8xbf16>
      %cst_35 = arith.constant dense<0.000000e+00> : vector<8x8xf32>
      %103 = tpu.matmul %100, %101, %cst_35 {dimension_numbers = #tpu.dot_dimension_numbers<[1], [1], [0], [0], [0, 0, 1, 0], [], []>} : vector<8x8xbf16>, vector<8x8xbf16>, vector<8x8xf32> -> vector<8x8xf32>
      %104 = arith.addf %103, %2 : vector<8x8xf32>
      %cst_36 = arith.constant dense<0xFF800000> : vector<8xf32>
      %105 = vector.multi_reduction <maximumf>, %104, %cst_36 [1] : vector<8x8xf32> to vector<8xf32>
      %106 = vector.shape_cast %105 : vector<8xf32> to vector<8x1xf32>
      %107 = vector.broadcast %106 : vector<8x1xf32> to vector<8x8xf32>
      %108 = arith.subf %104, %107 : vector<8x8xf32>
      %109 = math.exp %108 : vector<8x8xf32>
      %cst_37 = arith.constant dense<0.000000e+00> : vector<8xf32>
      %110 = vector.multi_reduction <add>, %109, %cst_37 [1] : vector<8x8xf32> to vector<8xf32>
      %111 = vector.shape_cast %110 : vector<8xf32> to vector<8x1xf32>
      %112 = tpu.reciprocal %111 {approx = true} : vector<8x1xf32> -> vector<8x1xf32>
      %113 = vector.broadcast %112 : vector<8x1xf32> to vector<8x8xf32>
      %114 = arith.mulf %109, %113 : vector<8x8xf32>
      %115 = arith.truncf %114 : vector<8x8xf32> to vector<8x8xbf16>
      %cst_38 = arith.constant dense<0.000000e+00> : vector<8x8xf32>
      %116 = tpu.matmul %115, %102, %cst_38 {dimension_numbers = #tpu.dot_dimension_numbers<[1], [0], [0], [1], [0, 0, 1, 1], [], []>} : vector<8x8xbf16>, vector<8x8xbf16>, vector<8x8xf32> -> vector<8x8xf32>
      %117 = arith.truncf %116 : vector<8x8xf32> to vector<8x8xbf16>
      %118 = vector.extract_strided_slice %56 {offsets = [16, 0], sizes = [8, 32], strides = [1, 1]} : vector<32x32xbf16> to vector<8x32xbf16>
      %cst_39 = arith.constant dense<0.000000e+00> : vector<8x32xf32>
      %119 = tpu.matmul %117, %118, %cst_39 {dimension_numbers = #tpu.dot_dimension_numbers<[1], [0], [0], [1], [0, 0, 1, 1], [], []>} : vector<8x8xbf16>, vector<8x32xbf16>, vector<8x32xf32> -> vector<8x32xf32>
      %120 = arith.addf %99, %119 : vector<8x32xf32>
      %121 = vector.extract_strided_slice %49 {offsets = [0, 24], sizes = [8, 8], strides = [1, 1]} : vector<8x32xbf16> to vector<8x8xbf16>
      %122 = vector.extract_strided_slice %51 {offsets = [0, 24], sizes = [8, 8], strides = [1, 1]} : vector<8x32xbf16> to vector<8x8xbf16>
      %123 = vector.extract_strided_slice %53 {offsets = [0, 24], sizes = [8, 8], strides = [1, 1]} : vector<8x32xbf16> to vector<8x8xbf16>
      %cst_40 = arith.constant dense<0.000000e+00> : vector<8x8xf32>
      %124 = tpu.matmul %121, %122, %cst_40 {dimension_numbers = #tpu.dot_dimension_numbers<[1], [1], [0], [0], [0, 0, 1, 0], [], []>} : vector<8x8xbf16>, vector<8x8xbf16>, vector<8x8xf32> -> vector<8x8xf32>
      %125 = arith.addf %124, %2 : vector<8x8xf32>
      %cst_41 = arith.constant dense<0xFF800000> : vector<8xf32>
      %126 = vector.multi_reduction <maximumf>, %125, %cst_41 [1] : vector<8x8xf32> to vector<8xf32>
      %127 = vector.shape_cast %126 : vector<8xf32> to vector<8x1xf32>
      %128 = vector.broadcast %127 : vector<8x1xf32> to vector<8x8xf32>
      %129 = arith.subf %125, %128 : vector<8x8xf32>
      %130 = math.exp %129 : vector<8x8xf32>
      %cst_42 = arith.constant dense<0.000000e+00> : vector<8xf32>
      %131 = vector.multi_reduction <add>, %130, %cst_42 [1] : vector<8x8xf32> to vector<8xf32>
      %132 = vector.shape_cast %131 : vector<8xf32> to vector<8x1xf32>
      %133 = tpu.reciprocal %132 {approx = true} : vector<8x1xf32> -> vector<8x1xf32>
      %134 = vector.broadcast %133 : vector<8x1xf32> to vector<8x8xf32>
      %135 = arith.mulf %130, %134 : vector<8x8xf32>
      %136 = arith.truncf %135 : vector<8x8xf32> to vector<8x8xbf16>
      %cst_43 = arith.constant dense<0.000000e+00> : vector<8x8xf32>
      %137 = tpu.matmul %136, %123, %cst_43 {dimension_numbers = #tpu.dot_dimension_numbers<[1], [0], [0], [1], [0, 0, 1, 1], [], []>} : vector<8x8xbf16>, vector<8x8xbf16>, vector<8x8xf32> -> vector<8x8xf32>
      %138 = arith.truncf %137 : vector<8x8xf32> to vector<8x8xbf16>
      %139 = vector.extract_strided_slice %56 {offsets = [24, 0], sizes = [8, 32], strides = [1, 1]} : vector<32x32xbf16> to vector<8x32xbf16>
      %cst_44 = arith.constant dense<0.000000e+00> : vector<8x32xf32>
      %140 = tpu.matmul %138, %139, %cst_44 {dimension_numbers = #tpu.dot_dimension_numbers<[1], [0], [0], [1], [0, 0, 1, 1], [], []>} : vector<8x8xbf16>, vector<8x32xbf16>, vector<8x32xf32> -> vector<8x32xf32>
      %141 = arith.addf %120, %140 : vector<8x32xf32>
      %142 = arith.addf %arg17, %141 : vector<8x32xf32>
      %143 = arith.index_cast %arg16 : i32 to index
      %c0_45 = arith.constant 0 : index
      %c0_46 = arith.constant 0 : index
      %144 = vector.load %arg8[%143, %c0_45, %c0_46] : memref<4x1x32xf32, #tpu.memory_space<vmem>>, vector<1x1x32xf32>
      %145 = vector.shape_cast %144 : vector<1x1x32xf32> to vector<1x32xf32>
      %146 = vector.broadcast %145 : vector<1x32xf32> to vector<8x32xf32>
      %147 = arith.addf %142, %146 : vector<8x32xf32>
      %148 = arith.index_cast %arg16 : i32 to index
      %c0_47 = arith.constant 0 : index
      %c0_48 = arith.constant 0 : index
      %149 = vector.load %arg9[%148, %c0_47, %c0_48] : memref<4x1x32xf32, #tpu.memory_space<vmem>>, vector<1x1x32xf32>
      %150 = vector.shape_cast %149 : vector<1x1x32xf32> to vector<1x32xf32>
      %151 = arith.index_cast %arg16 : i32 to index
      %c0_49 = arith.constant 0 : index
      %c0_50 = arith.constant 0 : index
      %152 = vector.load %arg10[%151, %c0_49, %c0_50] : memref<4x1x32xf32, #tpu.memory_space<vmem>>, vector<1x1x32xf32>
      %153 = vector.shape_cast %152 : vector<1x1x32xf32> to vector<1x32xf32>
      %cst_51 = arith.constant dense<0.000000e+00> : vector<8xf32>
      %154 = vector.multi_reduction <add>, %147, %cst_51 [1] : vector<8x32xf32> to vector<8xf32>
      %155 = vector.shape_cast %154 : vector<8xf32> to vector<8x1xf32>
      %cst_52 = arith.constant 3.200000e+01 : f32
      %156 = vector.broadcast %cst_52 : f32 to vector<8x1xf32>
      %157 = arith.divf %155, %156 : vector<8x1xf32>
      %158 = vector.broadcast %157 : vector<8x1xf32> to vector<8x32xf32>
      %159 = arith.subf %147, %158 : vector<8x32xf32>
      %160 = arith.mulf %159, %159 : vector<8x32xf32>
      %cst_53 = arith.constant dense<0.000000e+00> : vector<8xf32>
      %161 = vector.multi_reduction <add>, %160, %cst_53 [1] : vector<8x32xf32> to vector<8xf32>
      %162 = vector.shape_cast %161 : vector<8xf32> to vector<8x1xf32>
      %cst_54 = arith.constant 3.200000e+01 : f32
      %163 = vector.broadcast %cst_54 : f32 to vector<8x1xf32>
      %164 = arith.divf %162, %163 : vector<8x1xf32>
      %165 = vector.broadcast %157 : vector<8x1xf32> to vector<8x32xf32>
      %166 = arith.subf %147, %165 : vector<8x32xf32>
      %cst_55 = arith.constant 9.99999974E-6 : f32
      %167 = vector.broadcast %cst_55 : f32 to vector<8x1xf32>
      %168 = arith.addf %164, %167 : vector<8x1xf32>
      %169 = math.rsqrt %168 : vector<8x1xf32>
      %170 = vector.broadcast %169 : vector<8x1xf32> to vector<8x32xf32>
      %171 = arith.mulf %166, %170 : vector<8x32xf32>
      %172 = vector.broadcast %150 : vector<1x32xf32> to vector<8x32xf32>
      %173 = arith.mulf %171, %172 : vector<8x32xf32>
      %174 = vector.broadcast %153 : vector<1x32xf32> to vector<8x32xf32>
      %175 = arith.addf %173, %174 : vector<8x32xf32>
      %176 = arith.truncf %175 : vector<8x32xf32> to vector<8x32xbf16>
      %177 = arith.index_cast %arg16 : i32 to index
      %c0_56 = arith.constant 0 : index
      %c0_57 = arith.constant 0 : index
      %178 = vector.load %arg11[%177, %c0_56, %c0_57] : memref<4x32x128xbf16, #tpu.memory_space<vmem>>, vector<1x32x128xbf16>
      %179 = vector.shape_cast %178 : vector<1x32x128xbf16> to vector<32x128xbf16>
      %cst_58 = arith.constant dense<0.000000e+00> : vector<8x128xf32>
      %180 = tpu.matmul %176, %179, %cst_58 {dimension_numbers = #tpu.dot_dimension_numbers<[1], [0], [0], [1], [0, 0, 1, 1], [], []>} : vector<8x32xbf16>, vector<32x128xbf16>, vector<8x128xf32> -> vector<8x128xf32>
      %181 = arith.index_cast %arg16 : i32 to index
      %c0_59 = arith.constant 0 : index
      %c0_60 = arith.constant 0 : index
      %182 = vector.load %arg12[%181, %c0_59, %c0_60] : memref<4x1x128xf32, #tpu.memory_space<vmem>>, vector<1x1x128xf32>
      %183 = vector.shape_cast %182 : vector<1x1x128xf32> to vector<1x128xf32>
      %184 = vector.broadcast %183 : vector<1x128xf32> to vector<8x128xf32>
      %185 = arith.addf %180, %184 : vector<8x128xf32>
      %186 = arith.mulf %185, %185 : vector<8x128xf32>
      %187 = arith.mulf %185, %186 : vector<8x128xf32>
      %cst_61 = arith.constant 4.471500e-02 : f32
      %188 = vector.broadcast %cst_61 : f32 to vector<8x128xf32>
      %189 = arith.mulf %188, %187 : vector<8x128xf32>
      %190 = arith.addf %185, %189 : vector<8x128xf32>
      %cst_62 = arith.constant 0.797884583 : f32
      %191 = vector.broadcast %cst_62 : f32 to vector<8x128xf32>
      %192 = arith.mulf %191, %190 : vector<8x128xf32>
      %193 = math.tanh %192 : vector<8x128xf32>
      %cst_63 = arith.constant 1.000000e+00 : f32
      %194 = vector.broadcast %cst_63 : f32 to vector<8x128xf32>
      %195 = arith.addf %194, %193 : vector<8x128xf32>
      %cst_64 = arith.constant 5.000000e-01 : f32
      %196 = vector.broadcast %cst_64 : f32 to vector<8x128xf32>
      %197 = arith.mulf %196, %195 : vector<8x128xf32>
      %198 = arith.mulf %185, %197 : vector<8x128xf32>
      %199 = arith.truncf %198 : vector<8x128xf32> to vector<8x128xbf16>
      %200 = arith.index_cast %arg16 : i32 to index
      %c0_65 = arith.constant 0 : index
      %c0_66 = arith.constant 0 : index
      %201 = vector.load %arg13[%200, %c0_65, %c0_66] : memref<4x128x32xbf16, #tpu.memory_space<vmem>>, vector<1x128x32xbf16>
      %202 = vector.shape_cast %201 : vector<1x128x32xbf16> to vector<128x32xbf16>
      %cst_67 = arith.constant dense<0.000000e+00> : vector<8x32xf32>
      %203 = tpu.matmul %199, %202, %cst_67 {dimension_numbers = #tpu.dot_dimension_numbers<[1], [0], [0], [1], [0, 0, 1, 1], [], []>} : vector<8x128xbf16>, vector<128x32xbf16>, vector<8x32xf32> -> vector<8x32xf32>
      %204 = arith.index_cast %arg16 : i32 to index
      %c0_68 = arith.constant 0 : index
      %c0_69 = arith.constant 0 : index
      %205 = vector.load %arg14[%204, %c0_68, %c0_69] : memref<4x1x32xf32, #tpu.memory_space<vmem>>, vector<1x1x32xf32>
      %206 = vector.shape_cast %205 : vector<1x1x32xf32> to vector<1x32xf32>
      %207 = vector.broadcast %206 : vector<1x32xf32> to vector<8x32xf32>
      %208 = arith.addf %203, %207 : vector<8x32xf32>
      %209 = arith.addf %147, %208 : vector<8x32xf32>
      scf.yield %209 : vector<8x32xf32>
    }
    %c4_i32_4 = arith.constant 4 : i32
    %c0_5 = arith.constant 0 : index
    %c0_6 = arith.constant 0 : index
    %c0_7 = arith.constant 0 : index
    %5 = vector.load %arg15[%c0_5, %c0_6, %c0_7] : memref<1x8x32xf32, #tpu.memory_space<vmem>>, vector<1x8x32xf32>
    %6 = vector.shape_cast %5 : vector<1x8x32xf32> to vector<8x32xf32>
    %7 = vector.shape_cast %4 : vector<8x32xf32> to vector<1x8x32xf32>
    tpu.vector_store %arg15[%c0_5, %c0_6, %c0_7], %7 {strides = array<i32>} : memref<1x8x32xf32, #tpu.memory_space<vmem>>, vector<1x8x32xf32>,
    return
  }
  func.func @transform_0(%arg0: i32) -> (i32, i32, i32) {
    %c0_i32 = arith.constant 0 : i32
    %c0_i32_0 = arith.constant 0 : i32
    %c0_i32_1 = arith.constant 0 : i32
    return %arg0, %c0_i32, %c0_i32_0 : i32, i32, i32
  }
  func.func @transform_1(%arg0: i32) -> (i32, i32) {
    %c0_i32 = arith.constant 0 : i32
    %c0_i32_0 = arith.constant 0 : i32
    %c0_i32_1 = arith.constant 0 : i32
    return %c0_i32, %c0_i32_0 : i32, i32
  }
  func.func @transform_2(%arg0: i32) -> (i32, i32, i32) {
    %c0_i32 = arith.constant 0 : i32
    %c0_i32_0 = arith.constant 0 : i32
    %c0_i32_1 = arith.constant 0 : i32
    %c0_i32_2 = arith.constant 0 : i32
    return %c0_i32, %c0_i32_0, %c0_i32_1 : i32, i32, i32
  }
  func.func @transform_3(%arg0: i32) -> (i32, i32, i32) {
    %c0_i32 = arith.constant 0 : i32
    %c0_i32_0 = arith.constant 0 : i32
    %c0_i32_1 = arith.constant 0 : i32
    %c0_i32_2 = arith.constant 0 : i32
    return %c0_i32, %c0_i32_0, %c0_i32_1 : i32, i32, i32
  }
  func.func @transform_4(%arg0: i32) -> (i32, i32, i32) {
    %c0_i32 = arith.constant 0 : i32
    %c0_i32_0 = arith.constant 0 : i32
    %c0_i32_1 = arith.constant 0 : i32
    %c0_i32_2 = arith.constant 0 : i32
    return %c0_i32, %c0_i32_0, %c0_i32_1 : i32, i32, i32
  }
  func.func @transform_5(%arg0: i32) -> (i32, i32, i32) {
    %c0_i32 = arith.constant 0 : i32
    %c0_i32_0 = arith.constant 0 : i32
    %c0_i32_1 = arith.constant 0 : i32
    %c0_i32_2 = arith.constant 0 : i32
    return %c0_i32, %c0_i32_0, %c0_i32_1 : i32, i32, i32
  }
  func.func @transform_6(%arg0: i32) -> (i32, i32, i32) {
    %c0_i32 = arith.constant 0 : i32
    %c0_i32_0 = arith.constant 0 : i32
    %c0_i32_1 = arith.constant 0 : i32
    %c0_i32_2 = arith.constant 0 : i32
    return %c0_i32, %c0_i32_0, %c0_i32_1 : i32, i32, i32
  }
  func.func @transform_7(%arg0: i32) -> (i32, i32, i32) {
    %c0_i32 = arith.constant 0 : i32
    %c0_i32_0 = arith.constant 0 : i32
    %c0_i32_1 = arith.constant 0 : i32
    %c0_i32_2 = arith.constant 0 : i32
    return %c0_i32, %c0_i32_0, %c0_i32_1 : i32, i32, i32
  }
  func.func @transform_8(%arg0: i32) -> (i32, i32, i32) {
    %c0_i32 = arith.constant 0 : i32
    %c0_i32_0 = arith.constant 0 : i32
    %c0_i32_1 = arith.constant 0 : i32
    %c0_i32_2 = arith.constant 0 : i32
    return %c0_i32, %c0_i32_0, %c0_i32_1 : i32, i32, i32
  }
  func.func @transform_9(%arg0: i32) -> (i32, i32, i32) {
    %c0_i32 = arith.constant 0 : i32
    %c0_i32_0 = arith.constant 0 : i32
    %c0_i32_1 = arith.constant 0 : i32
    %c0_i32_2 = arith.constant 0 : i32
    return %c0_i32, %c0_i32_0, %c0_i32_1 : i32, i32, i32
  }
  func.func @transform_10(%arg0: i32) -> (i32, i32, i32) {
    %c0_i32 = arith.constant 0 : i32
    %c0_i32_0 = arith.constant 0 : i32
    %c0_i32_1 = arith.constant 0 : i32
    %c0_i32_2 = arith.constant 0 : i32
    return %c0_i32, %c0_i32_0, %c0_i32_1 : i32, i32, i32
  }
  func.func @transform_11(%arg0: i32) -> (i32, i32, i32) {
    %c0_i32 = arith.constant 0 : i32
    %c0_i32_0 = arith.constant 0 : i32
    %c0_i32_1 = arith.constant 0 : i32
    %c0_i32_2 = arith.constant 0 : i32
    return %c0_i32, %c0_i32_0, %c0_i32_1 : i32, i32, i32
  }
  func.func @transform_12(%arg0: i32) -> (i32, i32, i32) {
    %c0_i32 = arith.constant 0 : i32
    %c0_i32_0 = arith.constant 0 : i32
    %c0_i32_1 = arith.constant 0 : i32
    %c0_i32_2 = arith.constant 0 : i32
    return %c0_i32, %c0_i32_0, %c0_i32_1 : i32, i32, i32
  }
  func.func @transform_13(%arg0: i32) -> (i32, i32, i32) {
    %c0_i32 = arith.constant 0 : i32
    %c0_i32_0 = arith.constant 0 : i32
    %c0_i32_1 = arith.constant 0 : i32
    %c0_i32_2 = arith.constant 0 : i32
    return %c0_i32, %c0_i32_0, %c0_i32_1 : i32, i32, i32
  }
  func.func @transform_14(%arg0: i32) -> (i32, i32, i32) {
    %c0_i32 = arith.constant 0 : i32
    %c0_i32_0 = arith.constant 0 : i32
    %c0_i32_1 = arith.constant 0 : i32
    return %arg0, %c0_i32, %c0_i32_0 : i32, i32, i32
  }
}

</mosaic_0001>

<bundles_post_ra>
// kernel: tpu_custom_call.1
= control target key start
LH: loop header
LB: loop body
LE: loop exit
PB: predicated region body
PF: predicated region fallthrough
CT: control target
= control target key end

     0   :  { %s1783_s0 = inlined_call_operand.vmem [shape: f32[2,8,32], index: 0, kind: input, shape index: {}]   ;;  %s1784_s1 = inlined_call_operand.vmem [shape: f32[8,8], index: 1, kind: input, shape index: {}]   ;;  %s1785_s2 = inlined_call_operand.vmem [shape: f32[4,1,32], index: 2, kind: input, shape index: {}]   ;;  %s1786_s3 = inlined_call_operand.vmem [shape: f32[4,1,32], index: 3, kind: input, shape index: {}]   ;;  %s1787_s4 = inlined_call_operand.vmem [shape: bf16[4,32,96], index: 4, kind: input, shape index: {}]   ;;  %s1788_s5 = inlined_call_operand.vmem [shape: f32[4,1,96], index: 5, kind: input, shape index: {}]   ;;  %s1789_s6 = inlined_call_operand.vmem [shape: bf16[4,32,32], index: 6, kind: input, shape index: {}]   ;;  %s1790_s7 = inlined_call_operand.vmem [shape: f32[4,1,32], index: 7, kind: input, shape index: {}]   ;;  %s1791_s8 = inlined_call_operand.vmem [shape: f32[4,1,32], index: 8, kind: input, shape index: {}]   ;;  %s1792_s9 = inlined_call_operand.vmem [shape: f32[4,1,32], index: 9, kind: input, shape index: {}]   ;;  %s1793_s10 = inlined_call_operand.vmem [shape: bf16[4,32,128], index: 10, kind: input, shape index: {}]   ;;  %s1794_s11 = inlined_call_operand.vmem [shape: f32[4,1,128], index: 11, kind: input, shape index: {}]   ;;  %s1795_s12 = inlined_call_operand.vmem [shape: bf16[4,128,32], index: 12, kind: input, shape index: {}]   ;;  %s1796_s13 = inlined_call_operand.vmem [shape: f32[4,1,32], index: 13, kind: input, shape index: {}]   ;;  %s1797_s14 = inlined_call_operand.hbm [shape: f32[2,8,32], index: 14, kind: output, shape index: {}]  }
   0x1   :  { %1805 = sst [smem:[#allocation11_spill]] %s1783_s0 }
   0x2   :  { %1806 = sst [smem:[#allocation12_spill]] %s1784_s1 }
   0x3   :  { %1807 = sst [smem:[#allocation13_spill]] %s1785_s2 }
   0x4   :  { %19 = vsyncpa [#allocation3], 0 }
   0x5   :  { %21 = vsyncpa [#allocation3 + $0x1], 0  ;;  %s1515_s29 = smov 0   ;;  %s1517_s30 = smov 0  }
   0x6   :  { %s1519_s15 = smov 0   ;;  %s1521_s16 = smov 0  }
   0x7 LB: > { %1808 = sst [smem:[#allocation5_spill]] %s1406_s29  ;;  %s1536_s17 = sadd.s32 4294967295, %s1418_s16   ;;  %s1418_s16 = sphi %s1521_s16, %s1827_s16   ;;  %s1414_s15 = sphi %s1519_s15, %s1829_s15   ;;  %s1410_s30 = sphi %s1517_s30, %s1831_s30   ;;  %s1406_s29 = sphi %s1515_s29, %s1830_s29  }
   0x8   : > { %1809 = sst [smem:[#allocation6_spill]] %s1414_s15  ;;  %s1155_s18 = sadd.s32 4294967294, %s1418_s16  }
   0x9   : > { %1810 = sst [smem:[#allocation7_spill]] %s1418_s16  ;;  %s1540_s19 = sadd.s32 1, %s1418_s16  }
   0xa   : > { %1811 = sst [smem:[#allocation8_spill]] %s1540_s19  ;;  %s333_s20 = sadd.s32 1, %s1414_s15 }
   0xb   : > { %s330_s21 = ssub.s32 %s1418_s16, %s1540_s19  ;;  %p343_p0 = scmp.ne.s32.totalorder %s1414_s15, %s1410_s30 }
   0xc   : > { %p331_p1 = scmp.eq.s32.totalorder %s330_s21, 0  ;;  %p344_p2 = scmp.eq.s32.totalorder %s1536_s17, 1 }
   0xd   : > { %p349_p3 = scmp.ne.s32.totalorder %s1410_s30, %s1406_s29  ;;  %p350_p4 = scmp.eq.s32.totalorder %s1155_s18, 1 }
   0xe   : > { %s1551_s22 = scalar_select %p331_p1, %s1414_s15, %s333_s20  }
   0xf   : > { %p1553_p5 = por %p344_p2, %p343_p0  ;;  %p1557_p6 = por %p350_p4, %p349_p3 }
  0x10   : > { %1812 = sst [smem:[#allocation9_spill]] %s1551_s22  ;;  %p1158_p7 = scmp.ge.s32.totalorder %s1418_s16, 1 }
  0x11   : > { %s1814_s24 = scalar_select %p1557_p6, 1, 0 }
  0x12   : > { %p414_p8 = scmp.lt.s32.totalorder %s1418_s16, 3 }
  0x13   : > { %1815 = sst [smem:[#allocation10_spill]] %s1814_s24 }
  0x14   : > { %p415_p9 = pnand %p1158_p7, %p414_p8 }
  0x15   : > { %s1802_s25 = sand.u32 (!%p415_p9), 1, %s1410_s30   ;;  %p459_p10 = scmp.lt.s32.totalorder (!%p415_p9), %s1536_s17, 1 }
  0x16   : > { %418 = sbr.rel (%p415_p9) target bundleno = 2316 (0x90c), region = 76  ;;  %s1816_s1 = sld [smem:[#allocation12_spill]] (!%p415_p9) }
  0x17   : > { %s1572_s28 = sshll.u32 (!%p415_p9), %s1802_s25, 3  ;;  %s1817_s0 = sld [smem:[#allocation11_spill]] (!%p415_p9) }
  0x18   : > { %s1581_s24 = smov (!%p415_p9), 0  }
  0x1b   : > { %s460_s18 = scalar_select %p459_p10, %s1536_s17, 1 }
  0x1c   : > { %v1568_v0 = vld [vmem:[%s1816_s1] sm:$0xff] }
  0x1d   : > { %s1160_s20 = sshll.u32 %s460_s18, 3 }
  0x1e   : > { %s462_s15 = scalar_lea.vmem %s1817_s0, %s1160_s20 }
  0x1f   : > { %v464_v1 = vld [vmem:[%s462_s15] sm:$0xff]  }
  0x20 LB: >> { %vm477_vm0 = vcmask 261120   ;;  %v1428_v3 = vmov 32.0   ;;  %s1818_s2 = sld [smem:[#allocation13_spill]]  ;;  %s475_s20 = scalar_lea.vmem %s1786_s3, %s1426_s24  ;;  %vm570_vm5 = vcmask 64512   ;;  %vm607_vm6 = vcmask 1043456   ;;  %s1426_s24 = sphi %s1581_s24, %s471_s24   ;;  %v1422_v1 = vphi %v464_v1, %v1820_v1  }
  0x21   : >> { %v478_v2 = vsel %vm477_vm0, %v1422_v1, 0.0  ;;  %1324 = vrcp.f32 %v1428_v3  ;;  %s523_s19 = scalar_lea.vmem %s1788_s5, %s1426_s24  ;;  %s1609_s0 = sshll.u32 %s1426_s24, 4  ;;  %v1317_v29 = vld [vmem:[%s475_s20] ss:$0 sm:$0xff] }
  0x22   : >> { %479 = vadd.xlane.f32.xlu0 %v478_v2  ;;  %s518_s16 = scalar_lea.vmem %s1787_s4, %s1609_s0  ;;  %v1318_v33 = vld [vmem:[%s523_s19] ss:$0 sm:$0xff]  ;;  %s1429_s1 = smov 88  }
  0x23   : >> { %v1235_v15 = vld [vmem:[%s518_s16 + $0x8] sm:$0xff]  ;;  %v1234_v16 = vld [vmem:[%s518_s16] sm:$0xff]  ;;  %s1430_s29 = smov 96   ;;  %s1431_s16 = smov 80  }
  0x24   : >> { %549 = vmatpush.bf16.msra.mxu0 %v1235_v15  ;;  %s1432_s19 = smov 112   ;;  %s1433_s25 = smov 64  }
  0x25   : >> { %s1434_s15 = smov 120   ;;  %s1435_s22 = smov 72  }
  0x26   : >> { %s473_s26 = scalar_lea.vmem %s1818_s2, %s1426_s24  ;;  %s1635_s20 = scalar_lea.vmem %s1789_s6, %s1609_s0 }
  0x27   : >> { %v1325_v4 = vpop.eup %1324  ;;  %v1316_v26 = vld [vmem:[%s473_s26] ss:$0 sm:$0xff]  ;;  %s1436_s26 = smov 104   ;;  %s1437_s21 = smov 40  }
  0x28   : >> { %v482_v5 = vmul.f32 32.0, %v1325_v4  ;;  %vm486_vm1 = vweird.f32 %v1325_v4  ;;  %550 = vmatpush.bf16.msra.mxu0 %v1234_v16  ;;  %v561_v59 = vld [vmem:[%s1635_s20] sm:$0xf]  ;;  %s1819_s27 = scalar_lea.vmem %s1791_s8, %s1426_s24 }
  0x29   : >> { %v708_v60 = vsel %vm607_vm6, %v561_v59, 0 }
  0x2a   : >> { %v483_v6 = vsub.f32 1.0, %v482_v5  ;;  %717 = vmatpush.bf16.msra.mxu1 %v708_v60  ;;  %v563_v60 = vld [vmem:[%s1635_s20 + $0x8] sm:$0xf] }
  0x2c   : >> { %v484_v7 = vmul.f32 %v1325_v4, %v483_v6 }
  0x2e   : >> { %v485_v8 = vadd.f32 %v1325_v4, %v484_v7 }
  0x30   : >> { %v1591_v9 = vsel %vm486_vm1, %v1325_v4, %v485_v8 }
  0x95   : >> { %v480_v10 = vpop.xlane.xlu0 %479 }
  0x96   : >> { %v488_v11 = vmul.f32 %v1591_v9, %v480_v10 }
  0x98   : >> { %v489_v12 = vsub.f32 %v1422_v1, %v488_v11 }
  0x9a   : >> { %v490_v13 = vmul.f32 %v489_v12, %v489_v12 }
  0x9c   : >> { %v491_v14 = vsel %vm477_vm0, %v490_v13, 0.0 }
  0x9d   : >> { %492 = vadd.xlane.f32.xlu0 %v491_v14 }
 0x110   : >> { %v493_v17 = vpop.xlane.xlu0 %492 }
 0x111   : >> { %v494_v18 = vmul.f32 %v493_v17, %v1591_v9 }
 0x113   : >> { %v495_v19 = vadd.f32 1e-05, %v494_v18 }
 0x115   : >> { %1326 = vrsqrt.f32 %v495_v19  ;;  %vm502_vm3 = vweird.f32 %v495_v19 }
 0x11b   : >> { %v1327_v20 = vpop.eup %1326 }
 0x11c   : >> { %v497_v21 = vmul.f32 %v1327_v20, %v495_v19  ;;  %vm503_vm2 = vweird.f32 %v1327_v20 }
 0x11d   : >> { %vm504_vm4 = vmor %vm502_vm3, %vm503_vm2 }
 0x11e   : >> { %v498_v22 = vmul.f32 %v1327_v20, %v497_v21 }
 0x120   : >> { %v499_v23 = vmul.f32 0.5, %v498_v22 }
 0x122   : >> { %v500_v24 = vsub.f32 1.5, %v499_v23 }
 0x124   : >> { %v501_v25 = vmul.f32 %v1327_v20, %v500_v24 }
 0x126   : >> { %v505_v27 = vsel %vm504_vm4, %v1327_v20, %v501_v25 }
 0x127   : >> { %v506_v28 = vmul.f32 %v505_v27, %v489_v12 }
 0x129   : >> { %v510_v30 = vmul.f32 %v1316_v26, %v506_v28 }
 0x12b   : >> { %v514_v31 = vadd.f32 %v1317_v29, %v510_v30 }
 0x12d   : >> { %v515_v32 = vpack.c.bf16 %v514_v31, %v514_v31 }
 0x12f   : >> { %1171 = vmatmul.msk.bf16.vlgmr.msra.gmra.mxu0 %vm477_vm0, %v515_v32 }
 0x1ac   : >> { %v552_v34 = vpop.f32.mrf.mxu0 }
 0x1ad   : >> { %v553_v35 = vadd.f32 %v1318_v33, %v552_v34 }
 0x1af   : >> { %v558_v36 = vpack.c.bf16 %v553_v35, %v553_v35  ;;  %v556_v40 = vmul.f32 0.35355338, %v553_v35 }
 0x1b1   : >> { %v566_v37 = vunpack.c.l.b16 %v558_v36  ;;  %v557_v41 = vpack.c.bf16 %v556_v40, %v556_v40 }
 0x1b3   : >> { %v1617_v38 = vpack.c.b16 %v566_v37, %v566_v37  ;;  %v626_v42 = vunpack.c.l.b16 %v557_v41 }
 0x1b4   : >> { %v554_v39 = vpop.f32.mrf.mxu0 }
 0x1b5   : >> { %630 = vrot.lane.b32.xlu0 %v1617_v38, %s1429_s1  ;;  %568 = vrot.lane.b32.xlu1 %v1617_v38, %s1430_s29  ;;  %v627_v43 = vpack.c.b16 %v626_v42, %v626_v42  ;;  %s1438_s1 = smov 56   ;;  %s1439_s29 = smov 48  }
 0x1bd   : >> { %725 = vrot.lane.b32.xlu0 %v1617_v38, %s1431_s16 }
 0x1c5   : >> { %723 = vrot.lane.b32.xlu0 %v627_v43, %s1432_s19 }
 0x227   : >> { %v631_v44 = vpop.permute.xlu0 %630  ;;  %v569_v45 = vpop.permute.xlu1 %568 }
 0x228   : >> { %v575_v46 = vsel %vm570_vm5, %v569_v45, 0  ;;  %v636_v47 = vsel %vm570_vm5, %v631_v44, 0 }
 0x229   : >> { %584 = vmatpush.bf16.xpose.msra.mxu3 %v575_v46 }
 0x22f   : >> { %v726_v48 = vpop.permute.xlu0 %725 }
 0x230   : >> { %v731_v49 = vsel %vm570_vm5, %v726_v48, 0  ;;  %1173 = vmatmul.msk.bf16.vlgmr.msra.gmra.mxu3 %vm570_vm5, %v557_v41 }
 0x231   : >> { %645 = vmatpush.bf16.xpose.msrb.mxu3 %v636_v47 }
 0x237   : >> { %v724_v8 = vpop.permute.xlu0 %723 }
 0x239   : >> { %740 = vmatpush.bf16.xpose.msra.mxu3 %v731_v49 }
 0x2b3   : >> { %v586_v50 = vpop.f32.mrf.mxu3 }
 0x2b4   : >> { %v587_v51 = vadd.f32 %v586_v50, %v1568_v0 }
 0x2b6   : >> { %v590_v52 = vsel %vm570_vm5, %v587_v51, -inf }
 0x2b7   : >> { %591 = vmax.xlane.f32.xlu1 %v590_v52 }
 0x2bb   : >> { %v588_v53 = vpop.f32.mrf.mxu3 }
 0x32a   : >> { %v592_v54 = vpop.xlane.xlu1 %591 }
 0x32b   : >> { %v593_v55 = vsub.f32 %v587_v51, %v592_v54 }
 0x32d   : >> { %v594_v56 = vmul.f32 1.442695, %v593_v55 }
 0x32f   : >> { %1328 = vpow2.f32 %v594_v56 }
 0x335   : >> { %v1329_v57 = vpop.eup %1328 }
 0x336   : >> { %v596_v58 = vsel %vm570_vm5, %v1329_v57, 0.0 }
 0x337   : >> { %597 = vadd.xlane.f32.xlu2 %v596_v58 }
 0x34f   : >> { %602 = vrot.lane.b32.xlu2 %v1617_v38, %s1433_s25  ;;  %s878_s25 = scalar_lea.vmem %s1790_s7, %s1426_s24 }
 0x357   : >> { %628 = vrot.lane.b32.xlu2 %v627_v43, %s1434_s15  ;;  %s1240_s15 = sshll.u32 %s1426_s24, 6 }
 0x358   : >> { %s1708_s2 = scalar_lea.vmem %s1795_s12, %s1240_s15 }
 0x35f   : >> { %802 = vrot.lane.b32.xlu2 %v1617_v38, %s1435_s22 }
 0x367   : >> { %800 = vrot.lane.b32.xlu2 %v627_v43, %s1436_s26 }
 0x3aa   : >> { %v598_v61 = vpop.xlane.xlu2 %597 }
 0x3ab   : >> { %1330 = vrcp.f32 %v598_v61  ;;  %v784_v61 = vsel %vm607_vm6, %v563_v60, 0 }
 0x3b1   : >> { %v1331_v62 = vpop.eup %1330 }
 0x3b2   : >> { %v603_v63 = vpop.permute.xlu2 %602  ;;  %v600_v2 = vmul.f32 %v1331_v62, %v1329_v57  ;;  %v562_v57 = vld [vmem:[%s1635_s20 + $0x4] sm:$0xf] }
 0x3b3   : >> { %v609_v3 = vsel %vm607_vm6, %v603_v63, 0  ;;  %v689_v58 = vsel %vm607_vm6, %v562_v57, 0 }
 0x3b4   : >> { %618 = vmatpush.bf16.msra.mxu2 %v609_v3  ;;  %v601_v4 = vpack.c.bf16 %v600_v2, %v600_v2  ;;  %698 = vmatpush.bf16.msrb.mxu0 %v689_v58  ;;  %v564_v3 = vld [vmem:[%s1635_s20 + $0xc] sm:$0xf]  ;;  %s886_s20 = scalar_lea.vmem %s1792_s9, %s1426_s24 }
 0x3b7   : >> { %1174 = vmatmul.msk.bf16.vlgmr.msra.gmra.mxu2 %vm570_vm5, %v601_v4  ;;  %v861_v4 = vsel %vm607_vm6, %v564_v3, 0 }
 0x3b8   : >> { %793 = vmatpush.bf16.msra.mxu0 %v784_v61 }
 0x3ba   : >> { %v629_v5 = vpop.permute.xlu2 %628 }
 0x3bb   : >> { %1175 = vmatmul.msk.bf16.vlgmr.msrb.gmra.mxu3 %vm570_vm5, %v629_v5 }
 0x3c2   : >> { %v803_v6 = vpop.permute.xlu2 %802 }
 0x3c3   : >> { %v808_v7 = vsel %vm570_vm5, %v803_v6, 0 }
 0x3c4   : >> { %817 = vmatpush.bf16.xpose.msrb.mxu1 %v808_v7 }
 0x3ca   : >> { %v801_v17 = vpop.permute.xlu2 %800 }
 0x3cb   : >> { %1179 = vmatmul.msk.bf16.vlgmr.msra.gmra.mxu3 %vm570_vm5, %v724_v8 }
 0x43a   : >> { %v620_v10 = vpop.f32.mrf.mxu2 }
 0x43b   : >> { %v624_v11 = vpack.c.bf16 %v620_v10, %v620_v10 }
 0x43d   : >> { %1178 = vmatmul.msk.bf16.vlgmr.msra.gmra.mxu1 %vm570_vm5, %v624_v11 }
 0x43e   : >> { %v647_v12 = vpop.f32.mrf.mxu3 }
 0x43f   : >> { %v648_v13 = vadd.f32 %v647_v12, %v1568_v0 }
 0x441   : >> { %v651_v14 = vsel %vm570_vm5, %v648_v13, -inf }
 0x442   : >> { %v622_v15 = vpop.f32.mrf.mxu2  ;;  %652 = vmax.xlane.f32.xlu1 %v651_v14 }
 0x446   : >> { %v649_v16 = vpop.f32.mrf.mxu3 }
 0x44d   : >> { %1182 = vmatmul.msk.bf16.vlgmr.msrb.gmra.mxu1 %vm570_vm5, %v801_v17 }
 0x44e   : >> { %v742_v18 = vpop.f32.mrf.mxu3 }
 0x44f   : >> { %v743_v19 = vadd.f32 %v742_v18, %v1568_v0 }
 0x451   : >> { %v746_v20 = vsel %vm570_vm5, %v743_v19, -inf }
 0x452   : >> { %747 = vmax.xlane.f32.xlu2 %v746_v20 }
 0x456   : >> { %v744_v21 = vpop.f32.mrf.mxu3 }
 0x46a   : >> { %835 = vrot.lane.b32.xlu2 %v1617_v38, %s1437_s21 }
 0x4b5   : >> { %v653_v22 = vpop.xlane.xlu1 %652 }
 0x4b6   : >> { %v654_v23 = vsub.f32 %v648_v13, %v653_v22 }
 0x4b8   : >> { %v655_v24 = vmul.f32 1.442695, %v654_v23  ;;  %v1319_v23 = vld [vmem:[%s878_s25] ss:$0 sm:$0xff]  ;;  %s920_s25 = scalar_lea.vmem %s1793_s10, %s1609_s0 }
 0x4ba   : >> { %1332 = vpow2.f32 %v655_v24  ;;  %v1651_v25 = vpop.f32.mrf.mxu1 }
 0x4c0   : >> { %v1333_v26 = vpop.eup %1332 }
 0x4c1   : >> { %v657_v27 = vsel %vm570_vm5, %v1333_v26, 0.0 }
 0x4c2   : >> { %v721_v28 = vpop.f32.mrf.mxu1  ;;  %658 = vadd.xlane.f32.xlu1 %v657_v27 }
 0x4c5   : >> { %v748_v29 = vpop.xlane.xlu2 %747 }
 0x4c6   : >> { %v749_v30 = vsub.f32 %v743_v19, %v748_v29 }
 0x4c8   : >> { %v750_v31 = vmul.f32 1.442695, %v749_v30 }
 0x4ca   : >> { %v819_v32 = vpop.f32.mrf.mxu1  ;;  %1334 = vpow2.f32 %v750_v31 }
 0x4cb   : >> { %v820_v33 = vadd.f32 %v819_v32, %v1568_v0  ;;  %v1239_v32 = vld [vmem:[%s920_s25 + $0x8] sm:$0xff] }
 0x4cd   : >> { %v836_v34 = vpop.permute.xlu2 %835  ;;  %v823_v35 = vsel %vm570_vm5, %v820_v33, -inf }
 0x4ce   : >> { %v841_v36 = vsel %vm607_vm6, %v836_v34, 0  ;;  %824 = vmax.xlane.f32.xlu0 %v823_v35  ;;  %v1248_v34 = vld [vmem:[%s1708_s2 + $0x38] sm:$0xff] }
 0x4cf   : >> { %850 = vmatpush.bf16.msrb.mxu3 %v841_v36  ;;  %1040 = vmatpush.bf16.msra.mxu1 %v1248_v34 }
 0x4d0   : >> { %v1335_v37 = vpop.eup %1334 }
 0x4d1   : >> { %v752_v40 = vsel %vm570_vm5, %v1335_v37, 0.0 }
 0x4d2   : >> { %v821_v39 = vpop.f32.mrf.mxu1 }
 0x4d6   : >> { %753 = vadd.xlane.f32.xlu0 %v752_v40 }
 0x4db   : >> { %663 = vrot.lane.b32.xlu1 %v1617_v38, %s1438_s1  ;;  %s987_s1 = scalar_lea.vmem %s1796_s13, %s1426_s24 }
 0x4ea   : >> { %758 = vrot.lane.b32.xlu0 %v1617_v38, %s1439_s29  ;;  %s925_s29 = scalar_lea.vmem %s1794_s11, %s1426_s24  ;;  %s471_s24 = sadd.s32 1, %s1426_s24  }
 0x4eb   : >> { %v1322_v57 = vld [vmem:[%s925_s29] ss:$0 sm:$0xff]  ;;  %p468_p11 = scmp.ge.s32.totalorder %s471_s24, 4  }
 0x4ec   : > { %s1821_s29 = scalar_lea.vmem (%p468_p11), [#allocation2], %s1572_s28  ;;  %s1823_s24 = sand.u32 (%p468_p11), 1, %s1410_s30  }
 0x4ed   : > { %s1822_s26 = smov (%p468_p11), %s1821_s29  ;;  %s1057_s21 = scalar_lea.sflag (%p468_p11), [#allocation3], %s1823_s24 }
 0x535   : >> { %v659_v41 = vpop.xlane.xlu1 %658 }
 0x536   : >> { %1336 = vrcp.f32 %v659_v41 }
 0x53c   : >> { %v1337_v45 = vpop.eup %1336 }
 0x53d   : >> { %v661_v47 = vmul.f32 %v1337_v45, %v1333_v26 }
 0x53f   : >> { %v662_v38 = vpack.c.bf16 %v661_v47, %v661_v47  ;;  %v1321_v47 = vld [vmem:[%s886_s20] ss:$0 sm:$0xff] }
 0x541   : >> { %v825_v42 = vpop.xlane.xlu0 %824 }
 0x542   : >> { %v826_v43 = vsub.f32 %v820_v33, %v825_v42  ;;  %v1238_v33 = vld [vmem:[%s920_s25] sm:$0xff]  ;;  %s1230_s25 = sshll.u32 (%p468_p11), %s1536_s17, 3 }
 0x543   : > { %s1067_s0 = scalar_lea.hbm (%p468_p11), %s1797_s14, %s1230_s25 }
 0x544   : >> { %v827_v44 = vmul.f32 1.442695, %v826_v43  ;;  %s1071_s18 = sshll.u32 (%p468_p11), %s1067_s0, 4  ;;  %s1072_s18 = int_to_ptr.hbm [resolvable:$true] %s1071_s18 }
 0x546   : >> { %1338 = vpow2.f32 %v827_v44 }
 0x549   : >> { %v754_v51 = vpop.xlane.xlu0 %753 }
 0x54a   : >> { %1340 = vrcp.f32 %v754_v51  ;;  %v1247_v51 = vld [vmem:[%s1708_s2 + $0x30] sm:$0xff] }
 0x54b   : >> { %1041 = vmatpush.bf16.msra.mxu1 %v1247_v51 }
 0x54c   : >> { %v1339_v46 = vpop.eup %1338 }
 0x54d   : >> { %v664_v48 = vpop.permute.xlu1 %663  ;;  %v829_v49 = vsel %vm570_vm5, %v1339_v46, 0.0 }
 0x54e   : >> { %830 = vadd.xlane.f32.xlu1 %v829_v49  ;;  %v669_v50 = vsel %vm607_vm6, %v664_v48, 0 }
 0x54f   : >> { %678 = vmatpush.bf16.msrb.mxu2 %v669_v50 }
 0x550   : >> { %v1341_v52 = vpop.eup %1340 }
 0x551   : >> { %v756_v53 = vmul.f32 %v1341_v52, %v1335_v37  ;;  %v1245_v52 = vld [vmem:[%s1708_s2 + $0x20] sm:$0xff] }
 0x552   : >> { %1176 = vmatmul.msk.bf16.vlgmr.msrb.gmra.mxu2 %vm570_vm5, %v662_v38  ;;  %v1246_v38 = vld [vmem:[%s1708_s2 + $0x28] sm:$0xff] }
 0x553   : >> { %v757_v56 = vpack.c.bf16 %v756_v53, %v756_v53  ;;  %1042 = vmatpush.bf16.msra.mxu1 %v1246_v38  ;;  %v1244_v53 = vld [vmem:[%s1708_s2 + $0x18] sm:$0xff] }
 0x557   : >> { %1043 = vmatpush.bf16.msra.mxu1 %v1245_v52 }
 0x55b   : >> { %1044 = vmatpush.bf16.msra.mxu1 %v1244_v53 }
 0x55c   : >> { %v759_v54 = vpop.permute.xlu0 %758 }
 0x55d   : >> { %v764_v55 = vsel %vm607_vm6, %v759_v54, 0  ;;  %v1243_v54 = vld [vmem:[%s1708_s2 + $0x10] sm:$0xff] }
 0x55e   : >> { %773 = vmatpush.bf16.msra.mxu2 %v764_v55  ;;  %v1242_v55 = vld [vmem:[%s1708_s2 + $0x8] sm:$0xff] }
 0x55f   : >> { %1045 = vmatpush.bf16.msra.mxu1 %v1243_v54 }
 0x562   : >> { %1180 = vmatmul.msk.bf16.vlgmr.msra.gmra.mxu2 %vm570_vm5, %v757_v56  ;;  %v1241_v56 = vld [vmem:[%s1708_s2] sm:$0xff]  ;;  %s1368_s2 = scalar_lea.hbm (%p468_p11), %s1797_s14, 16 }
 0x563   : >> { %870 = vmatpush.bf16.msrb.mxu2 %v861_v4  ;;  %1046 = vmatpush.bf16.msra.mxu1 %v1242_v55 }
 0x567   : >> { %1047 = vmatpush.bf16.msra.mxu1 %v1241_v56 }
 0x5c1   : >> { %v831_v59 = vpop.xlane.xlu1 %830 }
 0x5c2   : >> { %1342 = vrcp.f32 %v831_v59 }
 0x5c8   : >> { %v1343_v62 = vpop.eup %1342 }
 0x5c9   : >> { %v833_v63 = vmul.f32 %v1343_v62, %v1339_v46 }
 0x5cb   : >> { %v834_v2 = vpack.c.bf16 %v833_v63, %v833_v63 }
 0x5cd   : >> { %1183 = vmatmul.msk.bf16.vlgmr.msrb.gmra.mxu3 %vm570_vm5, %v834_v2 }
 0x5d5   : >> { %v680_v5 = vpop.f32.mrf.mxu2 }
 0x5d6   : >> { %v684_v6 = vpack.c.bf16 %v680_v5, %v680_v5 }
 0x5d8   : >> { %1177 = vmatmul.msk.bf16.vlgmr.msrb.gmra.mxu0 %vm570_vm5, %v684_v6 }
 0x5d9   : >> { %951 = vmatpush.bf16.msrb.mxu0 %v1239_v32 }
 0x5dd   : >> { %v682_v7 = vpop.f32.mrf.mxu2  ;;  %952 = vmatpush.bf16.msrb.mxu0 %v1238_v33 }
 0x5e5   : >> { %v775_v8 = vpop.f32.mrf.mxu2 }
 0x5e6   : >> { %v779_v10 = vpack.c.bf16 %v775_v8, %v775_v8 }
 0x5e8   : >> { %1181 = vmatmul.msk.bf16.vlgmr.msra.gmra.mxu0 %vm570_vm5, %v779_v10  ;;  %v1323_v10 = vld [vmem:[%s987_s1] ss:$0 sm:$0xff]  ;;  %s1362_s1 = sshra.s32 (%p468_p11), %s1072_s18, 4  ;;  %s1363_s1 = int_to_ptr.hbm [resolvable:$true] %s1362_s1 }
 0x5e9   : > { %s1364_s20 = scalar_lea.hbm (%p468_p11), %s1363_s1, 8  ;;  %p1369_p1 = scmp.lt.s32.totalorder (%p468_p11), %s1363_s1, %s1797_s14 }
 0x5ea   : > { %p1365_p12 = scmp.ne.s32.totalorder (%p468_p11), %s1363_s1, %s1364_s20  ;;  %p1370_p2 = scmp.lt.s32.totalorder (%p468_p11), %s1368_s2, %s1364_s20 }
 0x5ec   : > { %p1366_p13 = pnand (%p468_p11), %p1365_p12, %p1553_p5  ;;  %p1371_p3 = por (%p468_p11), %p1370_p2, %p1369_p1 }
 0x5ed   : >> { %v777_v11 = vpop.f32.mrf.mxu2 }
 0x5ee   : > { %p1367_p0 = pneg (%p468_p11), %p1366_p13 }
 0x5f0   : > { %p1372_p4 = pnand (%p468_p11), %p1371_p3, %p1367_p0 }
 0x650   : >> { %v852_v12 = vpop.f32.mrf.mxu3 }
 0x651   : >> { %v856_v13 = vpack.c.bf16 %v852_v12, %v852_v12 }
 0x653   : >> { %1184 = vmatmul.msk.bf16.vlgmr.msrb.gmra.mxu2 %vm570_vm5, %v856_v13 }
 0x655   : >> { %v700_v14 = vpop.f32.mrf.mxu0 }
 0x656   : >> { %v720_v17 = vadd.f32 %v1651_v25, %v700_v14 }
 0x658   : >> { %v854_v15 = vpop.f32.mrf.mxu3 }
 0x65d   : >> { %v702_v16 = vpop.f32.mrf.mxu0 }
 0x665   : >> { %v795_v18 = vpop.f32.mrf.mxu0 }
 0x666   : >> { %v799_v19 = vadd.f32 %v795_v18, %v720_v17 }
 0x66d   : >> { %v797_v20 = vpop.f32.mrf.mxu0 }
 0x6d6   : >> { %v872_v21 = vpop.f32.mrf.mxu2 }
 0x6d7   : >> { %v876_v22 = vadd.f32 %v872_v21, %v799_v19 }
 0x6d9   : >> { %v877_v24 = vadd.f32 %v1422_v1, %v876_v22 }
 0x6db   : >> { %v1685_v26 = vadd.f32 %v1319_v23, %v877_v24 }
 0x6dd   : >> { %v888_v25 = vsel %vm477_vm0, %v1685_v26, 0.0 }
 0x6de   : >> { %889 = vadd.xlane.f32.xlu2 %v888_v25  ;;  %v874_v27 = vpop.f32.mrf.mxu2 }
 0x751   : >> { %v890_v28 = vpop.xlane.xlu2 %889 }
 0x752   : >> { %v891_v29 = vmul.f32 %v890_v28, %v1591_v9 }
 0x754   : >> { %v892_v30 = vsub.f32 %v1685_v26, %v891_v29 }
 0x756   : >> { %v893_v31 = vmul.f32 %v892_v30, %v892_v30 }
 0x758   : >> { %v894_v1 = vsel %vm477_vm0, %v893_v31, 0.0 }
 0x759   : >> { %895 = vadd.xlane.f32.xlu0 %v894_v1 }
 0x7cc   : >> { %v896_v35 = vpop.xlane.xlu0 %895 }
 0x7cd   : >> { %v897_v36 = vmul.f32 %v896_v35, %v1591_v9  ;;  %v1320_v9 = vld [vmem:[%s1819_s27] ss:$0 sm:$0xff]  ;;  %s1069_s27 = sshll.u32 (%p468_p11), %s1822_s26, 4  ;;  %s1070_s27 = int_to_ptr.vmem [resolvable:$true] %s1069_s27 }
 0x7cf   : >> { %v898_v37 = vadd.f32 1e-05, %v897_v36 }
 0x7d1   : >> { %1344 = vrsqrt.f32 %v898_v37  ;;  %vm905_vm8 = vweird.f32 %v898_v37 }
 0x7d7   : >> { %v1345_v39 = vpop.eup %1344 }
 0x7d8   : >> { %v900_v40 = vmul.f32 %v1345_v39, %v898_v37  ;;  %vm906_vm7 = vweird.f32 %v1345_v39 }
 0x7d9   : >> { %vm907_vm9 = vmor %vm905_vm8, %vm906_vm7 }
 0x7da   : >> { %v901_v41 = vmul.f32 %v1345_v39, %v900_v40 }
 0x7dc   : >> { %v902_v42 = vmul.f32 0.5, %v901_v41 }
 0x7de   : >> { %v903_v43 = vsub.f32 1.5, %v902_v42 }
 0x7e0   : >> { %v904_v44 = vmul.f32 %v1345_v39, %v903_v43 }
 0x7e2   : >> { %v908_v45 = vsel %vm907_vm9, %v1345_v39, %v904_v44 }
 0x7e3   : >> { %v909_v46 = vmul.f32 %v908_v45, %v892_v30 }
 0x7e5   : >> { %v913_v48 = vmul.f32 %v1320_v9, %v909_v46 }
 0x7e7   : >> { %v917_v49 = vadd.f32 %v1321_v47, %v913_v48 }
 0x7e9   : >> { %v918_v50 = vpack.c.bf16 %v917_v49, %v917_v49 }
 0x7eb   : >> { %1194 = vmatmul.msk.bf16.vlgmr.msrb.gmra.mxu0 %vm477_vm0, %v918_v50 }
 0x868   : >> { %v954_v58 = vpop.f32.mrf.mxu0 }
 0x869   : >> { %v955_v59 = vadd.f32 %v1322_v57, %v954_v58 }
 0x86b   : >> { %v958_v60 = vmul.f32 %v955_v59, %v955_v59 }
 0x86d   : >> { %v959_v61 = vmul.f32 %v958_v60, %v955_v59 }
 0x86f   : >> { %v960_v62 = vmul.f32 0.044715, %v959_v61 }
 0x870   : >> { %v956_v63 = vpop.f32.mrf.mxu0 }
 0x871   : >> { %v961_v2 = vadd.f32 %v960_v62, %v955_v59 }
 0x873   : >> { %v962_v3 = vmul.f32 0.7978846, %v961_v2 }
 0x875   : >> { %1346 = vtanh.f32 %v962_v3 }
 0x87b   : >> { %v1347_v4 = vpop.eup %1346 }
 0x87c   : >> { %v964_v5 = vadd.f32 1.0, %v1347_v4 }
 0x87e   : >> { %v965_v6 = vmul.f32 0.5, %v964_v5 }
 0x880   : >> { %v966_v7 = vmul.f32 %v965_v6, %v955_v59 }
 0x882   : >> { %v967_v8 = vpack.c.bf16 %v966_v7, %v966_v7 }
 0x884   : >> { %1048 = vmatmul.bf16.vlgmr.msra.gmra.mxu1 %v967_v8 }
 0x901   : >> { %v1049_v11 = vpop.f32.mrf.mxu1 }
 0x902   : >> { %v1050_v12 = vadd.f32 %v1323_v10, %v1049_v11 }
 0x904   : >> { %v1053_v13 = vadd.f32 %v1050_v12, %v1685_v26  }
 0x905   : > { %470 = sbr.rel (!%p468_p11) target bundleno = 32 (0x20), region = 130 }
 0x906   : >> { %v1820_v1 = vmov %v1053_v13  ;;  %1055 = vst.msk [vmem:[%s1821_s29] sm:$0xff] (%p468_p11), %vm477_vm0, %v1053_v13 }
 0x909   : >> { %v1051_v14 = vpop.f32.mrf.mxu1 }
 0x90a   : > { %1375 = shalt.err (!%p1372_p4)
}
 0x90b   : > { %1249 = dma.vmem_to_hbm [thread:$0]  (%p1553_p5), %s1070_s27, 128, %s1072_s18, %s1057_s21  }
 0x90c PF: > { %s1824_s28 = sld [smem:[#allocation7_spill]] }
 0x90d   : > { %s1825_s25 = sld [smem:[#allocation5_spill]] }
 0x912   : > { %p1255_p7 = scmp.ge.s32.totalorder %s1824_s28, 2 }
 0x913   : > { %s1083_s22 = sand.u32 1, %s1825_s25  }
 0x914   : > { %p1252_p8 = pnand %p1255_p7, %p1557_p6  ;;  %s1084_s0 = scalar_lea.sflag [#allocation3], %s1083_s22 }
 0x916   : > { %p1253_p9 = pneg %p1252_p8 }
 0x918   : > { %1401 = dma.done.wait (%p1253_p9), %s1084_s0, 128  }
 0x919   : > { %1403 = vsyncadd (%p1253_p9), %s1084_s0, 4294967168  ;;  %s1827_s16 = sld [smem:[#allocation8_spill]]  ;;  %s1830_s29 = smov %s1410_s30 }
 0x91a   : > { %s1828_s26 = sld [smem:[#allocation6_spill]] }
 0x91b   : > { %s1829_s15 = sld [smem:[#allocation9_spill]] }
 0x91f   : > { %p24_p10 = scmp.ge.s32.totalorder %s1827_s16, 4  }
 0x920   : > { %s1831_s30 = smov %s1828_s26 }
 0x921   :  { %26 = sbr.rel (!%p24_p10) target bundleno = 7 (0x7), region = 141 }
 0x926   :  { %1090 = vsyncpa [#allocation3], 1 }
 0x927   :  { %1092 = vsyncpa [#allocation3 + $0x1], 1 }

</bundles_post_ra>
